<compile_context>
chip_gen: v6e
topology: v6e:2x2x1
jax: 0.10.0
libtpu: 0.0.40
codegen_flags: <defaults>
</compile_context>

<pallas_src>
import functools

import jax
import jax.numpy as jnp
from jax.experimental import pallas as pl
from jax.experimental.pallas import tpu as pltpu


def _round_up(x, m):
    return ((x + m - 1) // m) * m


def _largest_divisor_leq(n, cap):
    cap = max(1, min(n, cap))
    for d in range(cap, 0, -1):
        if n % d == 0:
            return d
    return 1


def _conv_act_stats_kernel(x_ref, wd_ref, bd_ref, wp_ref, bp_ref, alpha_ref,
                           y_ref, ssum_ref, ssq_ref, xbuf,
                           *, stride, pad, l_in, l_out, l_out_p, n_taps,
                           b_tile):
    """Depthwise conv + pointwise 1x1 (MXU) + PReLU + BN partial stats.

    Processes b_tile batch samples per grid step.
    x_ref:     (b_tile, C_in, L_in)   input samples
    wd_ref:    (C_in, K) f32          depthwise weights (groups == C_in)
    bd_ref:    (C_in, 1) f32          depthwise bias
    wp_ref:    (C_out, C_in) bf16     pointwise weights (cast once in wrapper)
    bp_ref:    (C_out, 1) f32         pointwise bias
    alpha_ref: (1,) f32 [SMEM]        PReLU slope (num_parameters=1)
    y_ref:     (b_tile, C_out, L_out_p) bf16   pre-BN activations (lane padded)
    ssum_ref:  (1, C_out, 1) f32      per-block BN sum over valid L_out
    ssq_ref:   (1, C_out, 1) f32      per-block BN sum of squares
    xbuf:      (b_tile, C_in, L_buf) f32       zero-padded input scratch
    """
    c_in = x_ref.shape[1]
    c_out = wp_ref.shape[0]
    l_buf = xbuf.shape[2]

    # Zero only the small constant pad/tail columns.  Re-done every step so the
    # kernel stays correct when the "parallel" batch axis is sharded across
    # TensorCores (program_id 0 may never run on the second core).
    if pad > 0:
        xbuf[:, :, :pad] = jnp.zeros((b_tile, c_in, pad), jnp.float32)
    right = l_buf - pad - l_in
    if right > 0:
        xbuf[:, :, pad + l_in:] = jnp.zeros((b_tile, c_in, right), jnp.float32)
    xbuf[:, :, pad:pad + l_in] = x_ref[...].astype(jnp.float32)
    # TODO(synk): for stride==1 the scratch copy could be removed entirely with
    # pltpu.roll-generated taps + edge masks (XLU instead of vst traffic).

    # Load small operands once per grid step (hoisted out of the sample loop).
    wd = wd_ref[...].astype(jnp.float32)        # (C_in, K)
    bd = bd_ref[...].astype(jnp.float32)        # (C_in, 1)
    wp = wp_ref[...]                            # (C_out, C_in) bf16
    bp = bp_ref[...].astype(jnp.float32)        # (C_out, 1)
    alpha = alpha_ref[0]

    mask_pad = (l_out_p != l_out)
    if mask_pad:
        lane = jax.lax.broadcasted_iota(jnp.int32, (c_out, l_out_p), 1)
        keep = lane < l_out

    def tap(s, k):
        if stride == 1:
            return xbuf[s, :, k:k + l_out_p]            # static lane slice
        # TODO(synk): for hot stride>1 configs, deinterleave x in the wrapper so
        # each tap becomes a dense lane slice instead of a strided lane read.
        return xbuf[s, :, pl.ds(k, l_out_p, stride=stride)]

    ssum_acc = jnp.zeros((c_out, 1), jnp.float32)
    ssq_acc = jnp.zeros((c_out, 1), jnp.float32)

    for s in range(b_tile):                              # trace-time unrolled
        # ---- depthwise conv: init from tap 0 with the bias folded in ----
        acc = tap(s, 0) * wd[:, 0:1] + bd                # (C_in, L_out_p) f32
        for k in range(1, n_taps):
            acc = acc + tap(s, k) * wd[:, k:k + 1]

        # ---- pointwise 1x1: one MXU matmul, bf16 operands / f32 acc ----
        y = jnp.dot(wp, acc.astype(jnp.bfloat16),
                    preferred_element_type=jnp.float32)  # (C_out, L_out_p)
        y = y + bp

        # ---- PReLU (single shared slope, scalar in SMEM) ----
        y = jnp.where(y > 0, y, alpha * y)

        y_ref[s] = y.astype(y_ref.dtype)                 # bf16 intermediate

        # ---- BN partial stats in f32; mask only if lane padding exists ----
        ym = jnp.where(keep, y, 0.0) if mask_pad else y
        ssum_acc = ssum_acc + jnp.sum(ym, axis=-1, keepdims=True)
        ssq_acc = ssq_acc + jnp.sum(ym * ym, axis=-1, keepdims=True)

    ssum_ref[0] = ssum_acc
    ssq_ref[0] = ssq_acc


def _bn_affine_kernel(y_ref, scale_ref, shift_ref, o_ref):
    """Folded BatchNorm affine: o = y * scale + shift (per output channel)."""
    o_ref[...] = (y_ref[...].astype(jnp.float32) * scale_ref[...]
                  + shift_ref[...])


def sepconv1d_forward(x, params, *, kernel, stride, pad, eps=1e-5):
    """x: (N, C_in, L) float32.  Returns (N, C_out, L_out) float32."""
    n, ci, l = x.shape
    co = params["wp"].shape[0]
    l_out = (l + 2 * pad - kernel) // stride + 1
    l_out_p = _round_up(l_out, 128)                         # lane-dense output
    l_buf = max(stride * (l_out_p - 1) + kernel, pad + l)   # padded-input scratch

    # ---- phase-1 batch tile derived from a VMEM budget (v7x-safe) ----
    fixed_bytes = 2 * (ci * kernel * 4 + ci * 4 + co * ci * 2 + co * 4) + 4096
    per_sample = (2 * ci * l * 4            # x block, double buffered
                  + 2 * co * l_out_p * 2    # bf16 y block, double buffered
                  + ci * l_buf * 4)         # xbuf scratch
    budget = 36 * 1024 * 1024
    cap = max(1, min(8, (budget - fixed_bytes) // max(per_sample, 1)))
    b_tile = _largest_divisor_leq(n, cap)
    n_blocks = n // b_tile
    vmem_p1 = int(min(max(fixed_bytes + b_tile * per_sample + (2 << 20),
                          8 << 20), 100 * 1024 * 1024))
    # TODO(synk): add a halo'd "parallel" L-tile grid axis so very long L also
    # fits v7x's 64 MiB/TC VMEM and both TensorCores can split within a sample.

    wp_bf16 = params["wp"].astype(jnp.bfloat16)   # cast once; MXU-native operand

    kern = functools.partial(_conv_act_stats_kernel, stride=stride, pad=pad,
                             l_in=l, l_out=l_out, l_out_p=l_out_p,
                             n_taps=kernel, b_tile=b_tile)

    flops = n * l_out_p * (2 * ci * kernel + 2 * co * ci + 6 * co)
    bytes_accessed = (4 * n * ci * l + 2 * n * co * l_out_p
                      + 8 * n_blocks * co
                      + 4 * (ci * kernel + ci + co + 1) + 2 * co * ci)

    y, ssum, ssq = pl.pallas_call(
        kern,
        grid=(n_blocks,),
        in_specs=[
            pl.BlockSpec((b_tile, ci, l), lambda i: (i, 0, 0)),      # x
            pl.BlockSpec((ci, kernel), lambda i: (0, 0)),            # depthwise w
            pl.BlockSpec((ci, 1), lambda i: (0, 0)),                 # depthwise b
            pl.BlockSpec((co, ci), lambda i: (0, 0)),                # pointwise w
            pl.BlockSpec((co, 1), lambda i: (0, 0)),                 # pointwise b
            pl.BlockSpec(memory_space=pltpu.MemorySpace.SMEM),       # PReLU alpha
        ],
        out_specs=(
            pl.BlockSpec((b_tile, co, l_out_p), lambda i: (i, 0, 0)),  # bf16 y
            pl.BlockSpec((1, co, 1), lambda i: (i, 0, 0)),             # sum
            pl.BlockSpec((1, co, 1), lambda i: (i, 0, 0)),             # sum sq
        ),
        out_shape=(
            jax.ShapeDtypeStruct((n, co, l_out_p), jnp.bfloat16),
            jax.ShapeDtypeStruct((n_blocks, co, 1), jnp.float32),
            jax.ShapeDtypeStruct((n_blocks, co, 1), jnp.float32),
        ),
        scratch_shapes=[pltpu.VMEM((b_tile, ci, l_buf), jnp.float32)],
        compiler_params=pltpu.CompilerParams(
            dimension_semantics=("parallel",),
            vmem_limit_bytes=vmem_p1),
        cost_estimate=pl.CostEstimate(flops=flops, transcendentals=0,
                                      bytes_accessed=bytes_accessed),
    )(x, params["wd"], params["bd"], wp_bf16, params["bp"], params["alpha"])

    # ---- tiny cross-block stats reduction -> folded BN affine (train mode) ----
    count = n * l_out
    mean = jnp.sum(ssum[:, :, 0], axis=0) / count                   # (C_out,)
    var = jnp.maximum(jnp.sum(ssq[:, :, 0], axis=0) / count - mean * mean, 0.0)
    inv = jax.lax.rsqrt(var + eps)
    g = params["gamma"][:, 0]
    b = params["beta"][:, 0]
    scale = (g * inv)[:, None].astype(jnp.float32)                  # (C_out, 1)
    shift = (b - mean * g * inv)[:, None].astype(jnp.float32)       # (C_out, 1)

    # ---- phase 2: folded BN affine over large lane-dense blocks ----
    budget2 = 8 * 1024 * 1024
    l_tile = 128
    for t in (l_out_p, 2048, 1024, 512, 256, 128):
        if t <= l_out_p and l_out_p % t == 0 and 2 * (2 + 4) * co * t <= budget2:
            l_tile = t
            break
    b2_cap = max(1, budget2 // max(2 * (2 + 4) * co * l_tile, 1))
    b2 = _largest_divisor_leq(n, b2_cap)

    out_p = pl.pallas_call(
        _bn_affine_kernel,
        grid=(n // b2, l_out_p // l_tile),
        in_specs=[
            pl.BlockSpec((b2, co, l_tile), lambda i, j: (i, 0, j)),
            pl.BlockSpec((co, 1), lambda i, j: (0, 0)),
            pl.BlockSpec((co, 1), lambda i, j: (0, 0)),
        ],
        out_specs=pl.BlockSpec((b2, co, l_tile), lambda i, j: (i, 0, j)),
        out_shape=jax.ShapeDtypeStruct((n, co, l_out_p), jnp.float32),
        compiler_params=pltpu.CompilerParams(
            dimension_semantics=("parallel", "parallel")),
    )(y, scale, shift)

    # drop the lane padding outside the kernel
    return out_p[:, :, :l_out]


def sepconv1d_reference(x, params, *, kernel, stride, pad, eps=1e-5):
    """Pure-JAX reference (f32 everywhere) for correctness checking."""
    n, ci, l = x.shape
    xp = jnp.pad(x, ((0, 0), (0, 0), (pad, pad)))
    l_out = (l + 2 * pad - kernel) // stride + 1
    dw = jnp.zeros((n, ci, l_out), jnp.float32)
    for k in range(kernel):
        dw = dw + xp[:, :, k:k + stride * l_out:stride] * params["wd"][None, :, k:k + 1]
    dw = dw + params["bd"][None, :, :]
    pw = jnp.einsum("oc,ncl->nol", params["wp"], dw) + params["bp"][None, :, :]
    act = jnp.where(pw > 0, pw, params["alpha"][0] * pw)
    mean = jnp.mean(act, axis=(0, 2))
    var = jnp.var(act, axis=(0, 2))
    norm = (act - mean[None, :, None]) * jax.lax.rsqrt(var[None, :, None] + eps)
    return norm * params["gamma"][None, :, :] + params["beta"][None, :, :]


def init_params(key, ni, no, kernel):
    """Deterministic parameter init mirroring PyTorch default init shapes."""
    k1, k2, k3, k4 = jax.random.split(key, 4)
    # depthwise Conv1d(ni, ni, kernel, groups=ni): weight (ni, 1, K) -> (ni, K)
    bd_bound = 1.0 / jnp.sqrt(1.0 * kernel)
    wd = jax.random.uniform(k1, (ni, kernel), jnp.float32, -bd_bound, bd_bound)
    bd = jax.random.uniform(k2, (ni, 1), jnp.float32, -bd_bound, bd_bound)
    # pointwise Conv1d(ni, no, 1): weight (no, ni, 1) -> (no, ni)
    bp_bound = 1.0 / jnp.sqrt(1.0 * ni)
    wp = jax.random.uniform(k3, (no, ni), jnp.float32, -bp_bound, bp_bound)
    bp = jax.random.uniform(k4, (no, 1), jnp.float32, -bp_bound, bp_bound)
    return {
        "wd": wd, "bd": bd,
        "wp": wp, "bp": bp,
        "alpha": jnp.full((1,), 0.25, jnp.float32),     # nn.PReLU() default
        "gamma": jnp.ones((no, 1), jnp.float32),        # BatchNorm1d weight
        "beta": jnp.zeros((no, 1), jnp.float32),        # BatchNorm1d bias
    }


if __name__ == "__main__":
    # Small config consistent with SepConv1d(ni, no, kernel, stride, pad)
    N, NI, NO, L = 2, 4, 8, 16
    KERNEL, STRIDE, PAD = 3, 1, 1

    key = jax.random.PRNGKey(0)
    kx, kp = jax.random.split(key)
    x = jax.random.normal(kx, (N, NI, L), dtype=jnp.float32)
    params = init_params(kp, NI, NO, KERNEL)

    out = sepconv1d_forward(x, params, kernel=KERNEL, stride=STRIDE, pad=PAD)
    out = jax.block_until_ready(out)

    expected_lout = (L + 2 * PAD - KERNEL) // STRIDE + 1
    assert out.shape == (N, NO, expected_lout), out.shape
    assert bool(jnp.all(jnp.isfinite(out)))

    # Numerical check against a pure-JAX f32 reference (bf16 matmul operands
    # and bf16 intermediate storage -> loose tolerance is an explicit choice).
    ref = sepconv1d_reference(x, params, kernel=KERNEL, stride=STRIDE, pad=PAD)
    max_err = float(jnp.max(jnp.abs(out - ref)))
    assert max_err < 0.1, f"max abs error vs reference: {max_err}"

    print("KERNEL_OK")
</pallas_src>

<mosaic_0001>
module attributes {stable_mosaic.version = 11 : i64} {
  func.func @_conv_act_stats_kernel(%arg0: i32, %arg1: memref<2x4x16xf32, #tpu.memory_space<vmem>>, %arg2: memref<4x3xf32, #tpu.memory_space<vmem>>, %arg3: memref<4x1xf32, #tpu.memory_space<vmem>>, %arg4: memref<8x4xbf16, #tpu.memory_space<vmem>>, %arg5: memref<8x1xf32, #tpu.memory_space<vmem>>, %arg6: memref<1xf32, #tpu.memory_space<smem>>, %arg7: memref<2x8x128xbf16, #tpu.memory_space<vmem>>, %arg8: memref<1x8x1xf32, #tpu.memory_space<vmem>>, %arg9: memref<1x8x1xf32, #tpu.memory_space<vmem>>, %arg10: memref<2x4x130xf32, #tpu.memory_space<vmem>>) attributes {dimension_semantics = [#tpu.dimension_semantics<parallel>], iteration_bounds = array<i64: 1>, scalar_prefetch = 0 : i64, scratch_operands = 1 : i64, tpu.core_type = #tpu.core_type<tc>, window_params = [{transform_indices = @transform_0, window_bounds = array<i64: 2, 4, 16>}, {pipeline_mode = #tpu.pipeline_mode<synchronous>, transform_indices = @transform_1, window_bounds = array<i64: 4, 3>}, {pipeline_mode = #tpu.pipeline_mode<synchronous>, transform_indices = @transform_2, window_bounds = array<i64: 4, 1>}, {pipeline_mode = #tpu.pipeline_mode<synchronous>, transform_indices = @transform_3, window_bounds = array<i64: 8, 4>}, {pipeline_mode = #tpu.pipeline_mode<synchronous>, transform_indices = @transform_4, window_bounds = array<i64: 8, 1>}, {transform_indices = @transform_5, window_bounds = array<i64: 1>}, {transform_indices = @transform_6, window_bounds = array<i64: 2, 8, 128>}, {transform_indices = @transform_7, window_bounds = array<i64: 1, 8, 1>}, {transform_indices = @transform_8, window_bounds = array<i64: 1, 8, 1>}]} {
    %cst = arith.constant 0.000000e+00 : f32
    %0 = vector.broadcast %cst : f32 to vector<2x4x1xf32>
    %c0 = arith.constant 0 : index
    %c0_0 = arith.constant 0 : index
    %c0_1 = arith.constant 0 : index
    %1 = vector.load %arg10[%c0, %c0_0, %c0_1] : memref<2x4x130xf32, #tpu.memory_space<vmem>>, vector<2x4x1xf32>
    tpu.vector_store %arg10[%c0, %c0_0, %c0_1], %0 {strides = array<i32>} : memref<2x4x130xf32, #tpu.memory_space<vmem>>, vector<2x4x1xf32>,
    %cst_2 = arith.constant 0.000000e+00 : f32
    %2 = vector.broadcast %cst_2 : f32 to vector<2x4x113xf32>
    %c0_3 = arith.constant 0 : index
    %c0_4 = arith.constant 0 : index
    %c17 = arith.constant 17 : index
    %3 = vector.load %arg10[%c0_3, %c0_4, %c17] : memref<2x4x130xf32, #tpu.memory_space<vmem>>, vector<2x4x113xf32>
    tpu.vector_store %arg10[%c0_3, %c0_4, %c17], %2 {strides = array<i32>} : memref<2x4x130xf32, #tpu.memory_space<vmem>>, vector<2x4x113xf32>,
    %c0_5 = arith.constant 0 : index
    %c0_6 = arith.constant 0 : index
    %c0_7 = arith.constant 0 : index
    %4 = vector.load %arg1[%c0_5, %c0_6, %c0_7] : memref<2x4x16xf32, #tpu.memory_space<vmem>>, vector<2x4x16xf32>
    %c0_8 = arith.constant 0 : index
    %c0_9 = arith.constant 0 : index
    %c1 = arith.constant 1 : index
    %5 = vector.load %arg10[%c0_8, %c0_9, %c1] : memref<2x4x130xf32, #tpu.memory_space<vmem>>, vector<2x4x16xf32>
    tpu.vector_store %arg10[%c0_8, %c0_9, %c1], %4 {strides = array<i32>} : memref<2x4x130xf32, #tpu.memory_space<vmem>>, vector<2x4x16xf32>,
    %c0_10 = arith.constant 0 : index
    %c0_11 = arith.constant 0 : index
    %6 = vector.load %arg2[%c0_10, %c0_11] : memref<4x3xf32, #tpu.memory_space<vmem>>, vector<4x3xf32>
    %c0_12 = arith.constant 0 : index
    %c0_13 = arith.constant 0 : index
    %7 = vector.load %arg3[%c0_12, %c0_13] : memref<4x1xf32, #tpu.memory_space<vmem>>, vector<4x1xf32>
    %c0_14 = arith.constant 0 : index
    %c0_15 = arith.constant 0 : index
    %8 = vector.load %arg4[%c0_14, %c0_15] : memref<8x4xbf16, #tpu.memory_space<vmem>>, vector<8x4xbf16>
    %c0_16 = arith.constant 0 : index
    %c0_17 = arith.constant 0 : index
    %9 = vector.load %arg5[%c0_16, %c0_17] : memref<8x1xf32, #tpu.memory_space<vmem>>, vector<8x1xf32>
    %c0_18 = arith.constant 0 : index
    %10 = memref.load %arg6[%c0_18] : memref<1xf32, #tpu.memory_space<smem>>
    %11 = tpu.iota {dimensions = array<i32: 1>} : vector<8x128xi32>
    %c16_i32 = arith.constant 16 : i32
    %12 = vector.broadcast %c16_i32 : i32 to vector<8x128xi32>
    %13 = arith.cmpi slt, %11, %12 : vector<8x128xi32>
    %cst_19 = arith.constant 0.000000e+00 : f32
    %14 = vector.broadcast %cst_19 : f32 to vector<8x1xf32>
    %cst_20 = arith.constant 0.000000e+00 : f32
    %15 = vector.broadcast %cst_20 : f32 to vector<8x1xf32>
    %c0_21 = arith.constant 0 : index
    %c0_22 = arith.constant 0 : index
    %c0_23 = arith.constant 0 : index
    %16 = vector.load %arg10[%c0_21, %c0_22, %c0_23] : memref<2x4x130xf32, #tpu.memory_space<vmem>>, vector<1x4x128xf32>
    %17 = vector.shape_cast %16 : vector<1x4x128xf32> to vector<4x128xf32>
    %18 = vector.extract_strided_slice %6 {offsets = [0, 0], sizes = [4, 1], strides = [1, 1]} : vector<4x3xf32> to vector<4x1xf32>
    %19 = vector.broadcast %18 : vector<4x1xf32> to vector<4x128xf32>
    %20 = arith.mulf %17, %19 : vector<4x128xf32>
    %21 = vector.broadcast %7 : vector<4x1xf32> to vector<4x128xf32>
    %22 = arith.addf %20, %21 : vector<4x128xf32>
    %c0_24 = arith.constant 0 : index
    %c0_25 = arith.constant 0 : index
    %c1_26 = arith.constant 1 : index
    %23 = vector.load %arg10[%c0_24, %c0_25, %c1_26] : memref<2x4x130xf32, #tpu.memory_space<vmem>>, vector<1x4x128xf32>
    %24 = vector.shape_cast %23 : vector<1x4x128xf32> to vector<4x128xf32>
    %25 = vector.extract_strided_slice %6 {offsets = [0, 1], sizes = [4, 1], strides = [1, 1]} : vector<4x3xf32> to vector<4x1xf32>
    %26 = vector.broadcast %25 : vector<4x1xf32> to vector<4x128xf32>
    %27 = arith.mulf %24, %26 : vector<4x128xf32>
    %28 = arith.addf %22, %27 : vector<4x128xf32>
    %c0_27 = arith.constant 0 : index
    %c0_28 = arith.constant 0 : index
    %c2 = arith.constant 2 : index
    %29 = vector.load %arg10[%c0_27, %c0_28, %c2] : memref<2x4x130xf32, #tpu.memory_space<vmem>>, vector<1x4x128xf32>
    %30 = vector.shape_cast %29 : vector<1x4x128xf32> to vector<4x128xf32>
    %31 = vector.extract_strided_slice %6 {offsets = [0, 2], sizes = [4, 1], strides = [1, 1]} : vector<4x3xf32> to vector<4x1xf32>
    %32 = vector.broadcast %31 : vector<4x1xf32> to vector<4x128xf32>
    %33 = arith.mulf %30, %32 : vector<4x128xf32>
    %34 = arith.addf %28, %33 : vector<4x128xf32>
    %35 = arith.truncf %34 : vector<4x128xf32> to vector<4x128xbf16>
    %cst_29 = arith.constant dense<0.000000e+00> : vector<8x128xf32>
    %36 = tpu.matmul %8, %35, %cst_29 {dimension_numbers = #tpu.dot_dimension_numbers<[1], [0], [0], [1], [0, 0, 1, 1], [], []>} : vector<8x4xbf16>, vector<4x128xbf16>, vector<8x128xf32> -> vector<8x128xf32>
    %37 = vector.broadcast %9 : vector<8x1xf32> to vector<8x128xf32>
    %38 = arith.addf %36, %37 : vector<8x128xf32>
    %cst_30 = arith.constant 0.000000e+00 : f32
    %39 = vector.broadcast %cst_30 : f32 to vector<8x128xf32>
    %40 = arith.cmpf ogt, %38, %39 : vector<8x128xf32>
    %41 = vector.broadcast %10 : f32 to vector<8x128xf32>
    %42 = arith.mulf %41, %38 : vector<8x128xf32>
    %43 = arith.select %40, %38, %42 : vector<8x128xi1>, vector<8x128xf32>
    %44 = arith.truncf %43 : vector<8x128xf32> to vector<8x128xbf16>
    %c0_31 = arith.constant 0 : index
    %c0_32 = arith.constant 0 : index
    %c0_33 = arith.constant 0 : index
    %45 = vector.load %arg7[%c0_31, %c0_32, %c0_33] : memref<2x8x128xbf16, #tpu.memory_space<vmem>>, vector<1x8x128xbf16>
    %46 = vector.shape_cast %45 : vector<1x8x128xbf16> to vector<8x128xbf16>
    %47 = vector.shape_cast %44 : vector<8x128xbf16> to vector<1x8x128xbf16>
    tpu.vector_store %arg7[%c0_31, %c0_32, %c0_33], %47 {strides = array<i32>} : memref<2x8x128xbf16, #tpu.memory_space<vmem>>, vector<1x8x128xbf16>,
    %cst_34 = arith.constant 0.000000e+00 : f32
    %48 = vector.broadcast %cst_34 : f32 to vector<8x128xf32>
    %49 = arith.select %13, %43, %48 : vector<8x128xi1>, vector<8x128xf32>
    %cst_35 = arith.constant dense<0.000000e+00> : vector<8xf32>
    %50 = vector.multi_reduction <add>, %49, %cst_35 [1] : vector<8x128xf32> to vector<8xf32>
    %51 = vector.shape_cast %50 : vector<8xf32> to vector<8x1xf32>
    %52 = arith.addf %14, %51 : vector<8x1xf32>
    %53 = arith.mulf %49, %49 : vector<8x128xf32>
    %cst_36 = arith.constant dense<0.000000e+00> : vector<8xf32>
    %54 = vector.multi_reduction <add>, %53, %cst_36 [1] : vector<8x128xf32> to vector<8xf32>
    %55 = vector.shape_cast %54 : vector<8xf32> to vector<8x1xf32>
    %56 = arith.addf %15, %55 : vector<8x1xf32>
    %c1_37 = arith.constant 1 : index
    %c0_38 = arith.constant 0 : index
    %c0_39 = arith.constant 0 : index
    %57 = vector.load %arg10[%c1_37, %c0_38, %c0_39] : memref<2x4x130xf32, #tpu.memory_space<vmem>>, vector<1x4x128xf32>
    %58 = vector.shape_cast %57 : vector<1x4x128xf32> to vector<4x128xf32>
    %59 = vector.extract_strided_slice %6 {offsets = [0, 0], sizes = [4, 1], strides = [1, 1]} : vector<4x3xf32> to vector<4x1xf32>
    %60 = vector.broadcast %59 : vector<4x1xf32> to vector<4x128xf32>
    %61 = arith.mulf %58, %60 : vector<4x128xf32>
    %62 = vector.broadcast %7 : vector<4x1xf32> to vector<4x128xf32>
    %63 = arith.addf %61, %62 : vector<4x128xf32>
    %c1_40 = arith.constant 1 : index
    %c0_41 = arith.constant 0 : index
    %c1_42 = arith.constant 1 : index
    %64 = vector.load %arg10[%c1_40, %c0_41, %c1_42] : memref<2x4x130xf32, #tpu.memory_space<vmem>>, vector<1x4x128xf32>
    %65 = vector.shape_cast %64 : vector<1x4x128xf32> to vector<4x128xf32>
    %66 = vector.extract_strided_slice %6 {offsets = [0, 1], sizes = [4, 1], strides = [1, 1]} : vector<4x3xf32> to vector<4x1xf32>
    %67 = vector.broadcast %66 : vector<4x1xf32> to vector<4x128xf32>
    %68 = arith.mulf %65, %67 : vector<4x128xf32>
    %69 = arith.addf %63, %68 : vector<4x128xf32>
    %c1_43 = arith.constant 1 : index
    %c0_44 = arith.constant 0 : index
    %c2_45 = arith.constant 2 : index
    %70 = vector.load %arg10[%c1_43, %c0_44, %c2_45] : memref<2x4x130xf32, #tpu.memory_space<vmem>>, vector<1x4x128xf32>
    %71 = vector.shape_cast %70 : vector<1x4x128xf32> to vector<4x128xf32>
    %72 = vector.extract_strided_slice %6 {offsets = [0, 2], sizes = [4, 1], strides = [1, 1]} : vector<4x3xf32> to vector<4x1xf32>
    %73 = vector.broadcast %72 : vector<4x1xf32> to vector<4x128xf32>
    %74 = arith.mulf %71, %73 : vector<4x128xf32>
    %75 = arith.addf %69, %74 : vector<4x128xf32>
    %76 = arith.truncf %75 : vector<4x128xf32> to vector<4x128xbf16>
    %cst_46 = arith.constant dense<0.000000e+00> : vector<8x128xf32>
    %77 = tpu.matmul %8, %76, %cst_46 {dimension_numbers = #tpu.dot_dimension_numbers<[1], [0], [0], [1], [0, 0, 1, 1], [], []>} : vector<8x4xbf16>, vector<4x128xbf16>, vector<8x128xf32> -> vector<8x128xf32>
    %78 = vector.broadcast %9 : vector<8x1xf32> to vector<8x128xf32>
    %79 = arith.addf %77, %78 : vector<8x128xf32>
    %cst_47 = arith.constant 0.000000e+00 : f32
    %80 = vector.broadcast %cst_47 : f32 to vector<8x128xf32>
    %81 = arith.cmpf ogt, %79, %80 : vector<8x128xf32>
    %82 = vector.broadcast %10 : f32 to vector<8x128xf32>
    %83 = arith.mulf %82, %79 : vector<8x128xf32>
    %84 = arith.select %81, %79, %83 : vector<8x128xi1>, vector<8x128xf32>
    %85 = arith.truncf %84 : vector<8x128xf32> to vector<8x128xbf16>
    %c1_48 = arith.constant 1 : index
    %c0_49 = arith.constant 0 : index
    %c0_50 = arith.constant 0 : index
    %86 = vector.load %arg7[%c1_48, %c0_49, %c0_50] : memref<2x8x128xbf16, #tpu.memory_space<vmem>>, vector<1x8x128xbf16>
    %87 = vector.shape_cast %86 : vector<1x8x128xbf16> to vector<8x128xbf16>
    %88 = vector.shape_cast %85 : vector<8x128xbf16> to vector<1x8x128xbf16>
    tpu.vector_store %arg7[%c1_48, %c0_49, %c0_50], %88 {strides = array<i32>} : memref<2x8x128xbf16, #tpu.memory_space<vmem>>, vector<1x8x128xbf16>,
    %cst_51 = arith.constant 0.000000e+00 : f32
    %89 = vector.broadcast %cst_51 : f32 to vector<8x128xf32>
    %90 = arith.select %13, %84, %89 : vector<8x128xi1>, vector<8x128xf32>
    %cst_52 = arith.constant dense<0.000000e+00> : vector<8xf32>
    %91 = vector.multi_reduction <add>, %90, %cst_52 [1] : vector<8x128xf32> to vector<8xf32>
    %92 = vector.shape_cast %91 : vector<8xf32> to vector<8x1xf32>
    %93 = arith.addf %52, %92 : vector<8x1xf32>
    %94 = arith.mulf %90, %90 : vector<8x128xf32>
    %cst_53 = arith.constant dense<0.000000e+00> : vector<8xf32>
    %95 = vector.multi_reduction <add>, %94, %cst_53 [1] : vector<8x128xf32> to vector<8xf32>
    %96 = vector.shape_cast %95 : vector<8xf32> to vector<8x1xf32>
    %97 = arith.addf %56, %96 : vector<8x1xf32>
    %c0_54 = arith.constant 0 : index
    %c0_55 = arith.constant 0 : index
    %c0_56 = arith.constant 0 : index
    %98 = vector.load %arg8[%c0_54, %c0_55, %c0_56] : memref<1x8x1xf32, #tpu.memory_space<vmem>>, vector<1x8x1xf32>
    %99 = vector.shape_cast %98 : vector<1x8x1xf32> to vector<8x1xf32>
    %100 = vector.shape_cast %93 : vector<8x1xf32> to vector<1x8x1xf32>
    tpu.vector_store %arg8[%c0_54, %c0_55, %c0_56], %100 {strides = array<i32>} : memref<1x8x1xf32, #tpu.memory_space<vmem>>, vector<1x8x1xf32>,
    %c0_57 = arith.constant 0 : index
    %c0_58 = arith.constant 0 : index
    %c0_59 = arith.constant 0 : index
    %101 = vector.load %arg9[%c0_57, %c0_58, %c0_59] : memref<1x8x1xf32, #tpu.memory_space<vmem>>, vector<1x8x1xf32>
    %102 = vector.shape_cast %101 : vector<1x8x1xf32> to vector<8x1xf32>
    %103 = vector.shape_cast %97 : vector<8x1xf32> to vector<1x8x1xf32>
    tpu.vector_store %arg9[%c0_57, %c0_58, %c0_59], %103 {strides = array<i32>} : memref<1x8x1xf32, #tpu.memory_space<vmem>>, vector<1x8x1xf32>,
    return
  }
  func.func @transform_0(%arg0: i32) -> (i32, i32, i32) {
    %c0_i32 = arith.constant 0 : i32
    %c0_i32_0 = arith.constant 0 : i32
    %c0_i32_1 = arith.constant 0 : i32
    return %arg0, %c0_i32, %c0_i32_0 : i32, i32, i32
  }
  func.func @transform_1(%arg0: i32) -> (i32, i32) {
    %c0_i32 = arith.constant 0 : i32
    %c0_i32_0 = arith.constant 0 : i32
    %c0_i32_1 = arith.constant 0 : i32
    return %c0_i32, %c0_i32_0 : i32, i32
  }
  func.func @transform_2(%arg0: i32) -> (i32, i32) {
    %c0_i32 = arith.constant 0 : i32
    %c0_i32_0 = arith.constant 0 : i32
    %c0_i32_1 = arith.constant 0 : i32
    return %c0_i32, %c0_i32_0 : i32, i32
  }
  func.func @transform_3(%arg0: i32) -> (i32, i32) {
    %c0_i32 = arith.constant 0 : i32
    %c0_i32_0 = arith.constant 0 : i32
    %c0_i32_1 = arith.constant 0 : i32
    return %c0_i32, %c0_i32_0 : i32, i32
  }
  func.func @transform_4(%arg0: i32) -> (i32, i32) {
    %c0_i32 = arith.constant 0 : i32
    %c0_i32_0 = arith.constant 0 : i32
    %c0_i32_1 = arith.constant 0 : i32
    return %c0_i32, %c0_i32_0 : i32, i32
  }
  func.func @transform_5(%arg0: i32) -> i32 {
    %c0_i32 = arith.constant 0 : i32
    %c0_i32_0 = arith.constant 0 : i32
    return %c0_i32 : i32
  }
  func.func @transform_6(%arg0: i32) -> (i32, i32, i32) {
    %c0_i32 = arith.constant 0 : i32
    %c0_i32_0 = arith.constant 0 : i32
    %c0_i32_1 = arith.constant 0 : i32
    return %arg0, %c0_i32, %c0_i32_0 : i32, i32, i32
  }
  func.func @transform_7(%arg0: i32) -> (i32, i32, i32) {
    %c0_i32 = arith.constant 0 : i32
    %c0_i32_0 = arith.constant 0 : i32
    %c0_i32_1 = arith.constant 0 : i32
    return %arg0, %c0_i32, %c0_i32_0 : i32, i32, i32
  }
  func.func @transform_8(%arg0: i32) -> (i32, i32, i32) {
    %c0_i32 = arith.constant 0 : i32
    %c0_i32_0 = arith.constant 0 : i32
    %c0_i32_1 = arith.constant 0 : i32
    return %arg0, %c0_i32, %c0_i32_0 : i32, i32, i32
  }
}

</mosaic_0001>

<bundles_post_ra>
// kernel: tpu_custom_call.1
= control target key start
LH: loop header
LB: loop body
LE: loop exit
PB: predicated region body
PF: predicated region fallthrough
CT: control target
= control target key end

     0   :  { %v327_v2 = vmov 1   ;;  %s328_s9 = smov 1   ;;  %v329_v4 = vmov 0   ;;  %vm29_vm0 = vcmask 3072   ;;  %vm32_vm1 = vcmask 1043592   ;;  %s415_s0 = inlined_call_operand.vmem [shape: f32[2,4,16], index: 0, kind: input, shape index: {}]   ;;  %s416_s1 = inlined_call_operand.vmem [shape: f32[4,3], index: 1, kind: input, shape index: {}]   ;;  %s417_s2 = inlined_call_operand.vmem [shape: f32[4,1], index: 2, kind: input, shape index: {}]   ;;  %s418_s3 = inlined_call_operand.vmem [shape: bf16[8,4], index: 3, kind: input, shape index: {}]   ;;  %s419_s4 = inlined_call_operand.vmem [shape: f32[8,1], index: 4, kind: input, shape index: {}]   ;;  %s420_s5 = inlined_call_operand.<no memory space> [shape: f32[1], index: 5, kind: input, shape index: {}]   ;;  %s421_s6 = inlined_call_operand.hbm [shape: bf16[2,8,128], index: 6, kind: output, shape index: {0}]   ;;  %s422_s7 = inlined_call_operand.vmem [shape: f32[1,8,1], index: 7, kind: output, shape index: {1}]   ;;  %s423_s8 = inlined_call_operand.vmem [shape: f32[1,8,1], index: 8, kind: output, shape index: {2}]  }
   0x1   :  { %v37_v0 = vld [vmem:[%s415_s0] sm:$0xf]  ;;  %301 = vset.pattern.permute.xlu1 %v327_v2  ;;  %v38_v3 = vld [vmem:[%s415_s0 + $0x4] sm:$0xf]  ;;  %303 = vset.pattern.permute.xlu0 %v329_v4  ;;  %v330_v5 = vmov 0.0   ;;  %vm33_vm2 = vcmask 15364  }
   0x2   :  { %v50_v1 = vld [vmem:[%s416_s1] sm:$0xf]  ;;  %41 = vrot.lane.b32.xlu0 %v37_v0, %s328_s9  ;;  %30 = vst.msk [vmem:[#allocation2] sm:$0xf] %vm29_vm0, %v330_v5  ;;  %31 = vst.msk [vmem:[#allocation2 + $0x8] sm:$0xf] %vm29_vm0, %v330_v5  ;;  %278 = vmatprep.subr.bf16.mxu0 %v330_v5 }
   0x3   :  { %73 = vperm.xlu1 %301, %v50_v1   ;;  %284 = vmatprep.subr.bf16.mxu1 %v330_v5 }
   0x4   :  { %15 = vsyncpa [#allocation5], 0  ;;  %v331_v6 = vmov 2   ;;  %v51_v7 = vld [vmem:[%s417_s2] sm:$0xf]  ;;  %vm47_vm4 = vcmask 134152   ;;  %v55_v48 = vlaneseq  ;;  %v153_v52 = vstv %s420_s5 }
   0x5   :  { %vm34_vm3 = vmor %vm33_vm2, %vm32_vm1  ;;  %s332_s12 = smov 127   ;;  %vm333_vm5 = vmmov 0   ;;  %s334_s2 = smov 126   ;;  %v53_v18 = vld [vmem:[%s419_s4] sm:$0xff]  ;;  %vm81_vm6 = vcmask 1039360   ;;  %vm94_vm7 = vcmask 1031168  }
   0x6   :  { %43 = vrot.lane.b32.xlu0 %v38_v3, %s328_s9  ;;  %35 = vst.msk [vmem:[#allocation2] sm:$0xff] %vm34_vm3, %v330_v5  ;;  %36 = vst.msk [vmem:[#allocation2 + $0x8] sm:$0xff] %vm34_vm3, %v330_v5  ;;  %280 = vmatprep.mubr.msk.bf16.mxu0 %vm333_vm5, %v330_v5  ;;  %vm108_vm8 = vcmask 1041408   ;;  %v52_v47 = vld [vmem:[%s418_s3] sm:$0xf]  ;;  %vm104_vm9 = vcmask 31744  }
   0x7   :  { %302 = vset.pattern.permute.xlu1 %v331_v6  ;;  %286 = vmatprep.mubr.msk.bf16.mxu1 %vm333_vm5, %v330_v5  ;;  %v56_v49 = vand.u32 127, %v55_v48  ;;  %s335_s3 = smov [#allocation4]  }
   0x8   :  { %86 = vperm.xlu1 %302, %v50_v1   ;;  %s253_s5 = sshll.u32 %s335_s3, 4  ;;  %s254_s5 = int_to_ptr.vmem [resolvable:$true] %s253_s5 }
   0x9   :  { %vm57_vm10 = vcmp.lt.s32.totalorder %v56_v49, 16  ;;  %s305_s18 = scalar_lea.vmem %s254_s5, 128  ;;  %p310_p1 = scmp.lt.s32.totalorder %s254_s5, %s254_s5 }
   0xa   :  { %61 = vperm.xlu0 %303, %v50_v1   ;;  %p306_p0 = scmp.ne.s32.totalorder %s254_s5, %s305_s18  ;;  %p311_p2 = scmp.lt.s32.totalorder %s305_s18, %s305_s18 }
   0xc   :  { %304 = vset.pattern.permute.xlu1 %v329_v4  ;;  %p312_p3 = por %p311_p2, %p310_p1 }
   0xd   :  { %67 = vperm.xlu1 %304, %v51_v7  }
   0xe   :  { %p313_p4 = pnand %p312_p3, %p306_p0 }
  0x74   :  { %v42_v8 = vpop.permute.xlu0 %41 }
  0x75   :  { %48 = vst.msk [vmem:[#allocation2] sm:$0xf] %vm47_vm4, %v42_v8 }
  0x78   :  { %v44_v9 = vpop.permute.xlu0 %43 }
  0x79   :  { %49 = vst.msk [vmem:[#allocation2 + $0x8] sm:$0xf] %vm47_vm4, %v44_v9 }
  0x7c   :  { %v71_v10 = vld [vmem:[#allocation2] sm:$0xff] }
  0x7d   :  { %v58_v21 = vld [vmem:[#allocation2] sm:$0xf] }
  0x7e   :  { %v74_v11 = vpop.permute.xlu1 %73 }
  0x7f   :  { %v76_v12 = vmul.f32 %v74_v11, %v71_v10 }
  0x80   :  { %v170_v13 = vld [vmem:[#allocation2 + $0x8] sm:$0xff] }
  0x81   :  { %v171_v14 = vmul.f32 %v170_v13, %v74_v11  ;;  %78 = vrot.lane.b32.xlu1 %v76_v12, %s332_s12  ;;  %v167_v24 = vld [vmem:[#allocation2 + $0x8] sm:$0xf] }
  0x83   :  { %v87_v15 = vpop.permute.xlu1 %86  ;;  %173 = vrot.lane.b32.xlu0 %v171_v14, %s332_s12 }
  0x84   :  { %v89_v16 = vmul.f32 %v87_v15, %v71_v10  ;;  %v179_v17 = vmul.f32 %v170_v13, %v87_v15 }
  0x85   :  { %v62_v20 = vpop.permute.xlu0 %61 }
  0x86   :  { %91 = vrot.lane.b32.xlu1 %v89_v16, %s334_s2  ;;  %v64_v23 = vmul.f32 %v62_v20, %v58_v21  ;;  %v168_v26 = vmul.f32 %v167_v24, %v62_v20 }
  0x87   :  { %181 = vrot.lane.b32.xlu0 %v179_v17, %s334_s2 }
  0x88   :  { %v68_v19 = vpop.permute.xlu1 %67 }
  0x89   :  { %v70_v30 = vadd.f32 %v68_v19, %v64_v23  ;;  %v169_v33 = vadd.f32 %v168_v26, %v68_v19 }
  0x8a   :  { %101 = vperm.xlu1 %304, %v53_v18  }
  0xf3   :  { %v79_v22 = vpop.permute.xlu1 %78 }
  0xf4   :  { %v80_v25 = vrot.slane %v79_v22, 4 }
  0xf5   :  { %v174_v27 = vpop.permute.xlu0 %173 }
  0xf6   :  { %v175_v28 = vrot.slane %v174_v27, 4  ;;  %v82_v29 = vsel %vm81_vm6, %v79_v22, %v80_v25 }
  0xf7   :  { %v84_v36 = vadd.f32 %v82_v29, %v70_v30 }
  0xf8   :  { %v176_v31 = vsel %vm81_vm6, %v174_v27, %v175_v28  ;;  %v92_v32 = vpop.permute.xlu1 %91 }
  0xf9   :  { %v93_v34 = vrot.slane %v92_v32, 4  ;;  %v182_v35 = vpop.permute.xlu0 %181  ;;  %v178_v38 = vadd.f32 %v176_v31, %v169_v33 }
  0xfa   :  { %v183_v37 = vrot.slane %v182_v35, 4 }
  0xfb   :  { %v95_v39 = vsel %vm94_vm7, %v92_v32, %v93_v34 }
  0xfc   :  { %v97_v40 = vadd.f32 %v95_v39, %v84_v36  ;;  %v184_v41 = vsel %vm94_vm7, %v182_v35, %v183_v37 }
  0xfd   :  { %v186_v42 = vadd.f32 %v184_v41, %v178_v38 }
  0xfe   :  { %v98_v43 = vpack.c.bf16 %v97_v40, %v97_v40 }
  0xff   :  { %v187_v44 = vpack.c.bf16 %v186_v42, %v186_v42 }
 0x100   :  { %v110_v45 = vsel %vm108_vm8, %v98_v43, 0 }
 0x101   :  { %279 = vmatpush3.bf16.msra.mxu0 %v110_v45  ;;  %v189_v46 = vsel %vm108_vm8, %v187_v44, 0 }
 0x102   :  { %285 = vmatpush3.bf16.msra.mxu1 %v189_v46 }
 0x104   :  { %281 = vmatmul.mubr.msk.bf16.vlgmr.msra.gmra.mxu0 %vm104_vm9, %v52_v47 }
 0x105   :  { %287 = vmatmul.mubr.msk.bf16.vlgmr.msra.gmra.mxu1 %vm104_vm9, %v52_v47  ;;  %v102_v50 = vpop.permute.xlu1 %101 }
 0x1c4   :  { %v146_v51 = vpop.f32.mrf.mxu0 }
 0x1c5   :  { %v147_v53 = vadd.f32 %v146_v51, %v102_v50  ;;  %v225_v54 = vpop.f32.mrf.mxu1 }
 0x1c6   :  { %v226_v55 = vadd.f32 %v225_v54, %v102_v50  ;;  %v282_v56 = vpop.f32.mrf.mxu0 }
 0x1c7   :  { %v154_v57 = vmul.f32 %v153_v52, %v147_v53  ;;  %v288_v58 = vpop.f32.mrf.mxu1  ;;  %vm152_vm11 = vcmp.gt.f32.partialorder %v147_v53, 0.0 }
 0x1c8   :  { %v232_v59 = vmul.f32 %v226_v55, %v153_v52  ;;  %v149_v60 = vpop.f32.mrf.mxu0  ;;  %vm231_vm12 = vcmp.gt.f32.partialorder %v226_v55, 0.0 }
 0x1c9   :  { %v228_v61 = vpop.f32.mrf.mxu1  ;;  %v155_v62 = vsel %vm152_vm11, %v147_v53, %v154_v57 }
 0x1ca   :  { %v283_v63 = vpop.f32.mrf.mxu0  ;;  %v158_v0 = vsel %vm57_vm10, %v155_v62, 0.0  ;;  %v156_v1 = vpack.c.bf16 %v155_v62, %v155_v62  ;;  %v233_v2 = vsel %vm231_vm12, %v226_v55, %v232_v59 }
 0x1cb   :  { %v289_v3 = vpop.f32.mrf.mxu1  ;;  %159 = vadd.xlane.f32.xlu0 %v158_v0  ;;  %v162_v4 = vmul.f32 %v158_v0, %v158_v0  ;;  %v234_v5 = vpack.c.bf16 %v233_v2, %v233_v2  ;;  %v237_v6 = vsel %vm57_vm10, %v233_v2, 0.0 }
 0x1cc   :  { %157 = vst [vmem:[#allocation4] sm:$0xf] %v156_v1  ;;  %v241_v7 = vmul.f32 %v237_v6, %v237_v6 }
 0x1cd   :  { %163 = vadd.xlane.f32.xlu1 %v162_v4  ;;  %236 = vst [vmem:[#allocation4 + $0x4] sm:$0xf] %v234_v5 }
 0x1cf   :  { %238 = vadd.xlane.f32.xlu0 %v237_v6 }
 0x1d3   :  { %242 = vadd.xlane.f32.xlu0 %v241_v7 }
 0x1d4   :  { %316 = shalt.err (!%p313_p4)
}
 0x1d5   :  { %s336_s19 = smov 64   ;;  %s337_s20 = smov 4   ;;  %vm245_vm13 = vcmask 7168  }
 0x1d6   :  { %259 = dma.vmem_to_hbm [thread:$0]  %s254_s5, 128, %s421_s6, [#allocation5], %s336_s19, %s336_s19, %s337_s20  }
 0x254   :  { %v160_v8 = vpop.xlane.xlu0 %159 }
 0x256   :  { %v164_v11 = vpop.xlane.xlu1 %163 }
 0x258   :  { %v239_v9 = vpop.xlane.xlu0 %238 }
 0x259   :  { %v240_v10 = vadd.f32 %v239_v9, %v160_v8 }
 0x25b   :  { %246 = vst.msk [vmem:[%s422_s7] sm:$0xff] %vm245_vm13, %v240_v10 }
 0x25c   :  { %v243_v12 = vpop.xlane.xlu0 %242 }
 0x25d   :  { %v244_v13 = vadd.f32 %v243_v12, %v164_v11 }
 0x25f   :  { %247 = vst.msk [vmem:[%s423_s8] sm:$0xff] %vm245_vm13, %v244_v13 }
 0x260   :  { %325 = dma.done.wait [#allocation5], 128  }
 0x261   :  { %326 = vsyncadd [#allocation5], 4294967168 }
 0x262   :  { %271 = vsyncpa [#allocation5], 1 }

</bundles_post_ra>
